<compile_context>
chip_gen: v6e
topology: v6e:2x2x1
jax: 0.10.0
libtpu: 0.0.40
codegen_flags: <defaults>
</compile_context>

<pallas_src>
import jax
import jax.numpy as jnp
from jax.experimental import pallas as pl
from jax.experimental.pallas import tpu as pltpu

_PACK = 8      # batch rows packed onto the lane axis per "packed row"
_SUBLANE = 8   # f32 sublane granularity


def _round_up(n: int, m: int) -> int:
    return (n + m - 1) // m * m


def _mlp_kernel(x_ref, w1_ref, b1_ref, w2_ref, b2_ref, w3_ref, b3_ref, o_ref):
    # x_ref  : (tr, 8*In)     input dtype (f32); 8 batch rows per sublane row
    # w*_ref : (8*in, 8*out)  compute dtype; block-diagonal kron(I8, W.T)
    # b*_ref : (1, 8*out)     f32 (broadcast along sublanes)
    # o_ref  : (tr, 8*Out)    output dtype
    cdt = w1_ref.dtype
    x = x_ref[...].astype(cdt)

    h1 = jnp.dot(x, w1_ref[...], preferred_element_type=jnp.float32) + b1_ref[...]
    h1 = jnp.maximum(h1, 0.0)                       # f32 VPU math (v5e-safe)

    h2 = jnp.dot(h1.astype(cdt), w2_ref[...],
                 preferred_element_type=jnp.float32) + b2_ref[...]
    h2 = jnp.maximum(h2, 0.0)

    y = jnp.dot(h2.astype(cdt), w3_ref[...],
                preferred_element_type=jnp.float32) + b3_ref[...]
    o_ref[...] = y.astype(o_ref.dtype)


def path_time_predictor(x, params, *, batch_tile=16384, compute_dtype=jnp.bfloat16):
    """Forward pass of PathTimePredictor.

    x      : (B, input_size) float32
    params : dict with PyTorch-layout weights:
             w1 (h1, in), b1 (h1,), w2 (h2, h1), b2 (h2,), w3 (out, h2), b3 (out,)
    """
    w1, b1 = params["w1"], params["b1"]
    w2, b2 = params["w2"], params["b2"]
    w3, b3 = params["w3"], params["b3"]

    B, in_dim = x.shape
    h1_dim, h2_dim, out_dim = w1.shape[0], w2.shape[0], w3.shape[0]

    # ---- pack 8 batch rows onto the lane axis (free row-major reshape) ----
    B_pad = _round_up(max(B, _PACK), _PACK)
    if B_pad != B:
        x = jnp.pad(x, ((0, B_pad - B), (0, 0)))     # only for ragged batches
    R = B_pad // _PACK
    lane_in = _PACK * in_dim
    lane_h1 = _PACK * h1_dim
    lane_h2 = _PACK * h2_dim
    lane_out = _PACK * out_dim
    x_packed = x.reshape(R, lane_in)

    # ---- 8-way block-diagonal weights / tiled biases (tiny, built per call) ----
    eye = jnp.eye(_PACK, dtype=jnp.float32)
    w1b = jnp.kron(eye, w1.T.astype(jnp.float32)).astype(compute_dtype)
    w2b = jnp.kron(eye, w2.T.astype(jnp.float32)).astype(compute_dtype)
    w3b = jnp.kron(eye, w3.T.astype(jnp.float32)).astype(compute_dtype)
    b1b = jnp.tile(b1.astype(jnp.float32), _PACK).reshape(1, lane_h1)
    b2b = jnp.tile(b2.astype(jnp.float32), _PACK).reshape(1, lane_h2)
    b3b = jnp.tile(b3.astype(jnp.float32), _PACK).reshape(1, lane_out)

    # ---- batch tiling (in packed rows; 1 packed row = 8 batch rows) ----
    tr_default = max(_SUBLANE, (batch_tile // _PACK) // _SUBLANE * _SUBLANE)
    tr_floor = 8192 // _PACK     # never shrink a tile below ~8K batch rows
    tr = min(tr_default, R)
    if R >= 4 * tr_floor:
        # >= 4 grid steps (>= 2 per v7x TensorCore) so each core still
        # double-buffers its x DMA against compute.
        tr = min(tr, max(tr_floor, _round_up(pl.cdiv(R, 4), _SUBLANE)))
    grid = (pl.cdiv(R, tr),)

    itemsize = jnp.dtype(compute_dtype).itemsize
    weight_bytes = ((w1b.size + w2b.size + w3b.size) * itemsize
                    + (b1b.size + b2b.size + b3b.size) * 4)
    cost = pl.CostEstimate(
        flops=2 * R * (lane_in * lane_h1 + lane_h1 * lane_h2 + lane_h2 * lane_out),
        transcendentals=0,
        bytes_accessed=(x_packed.size * x_packed.dtype.itemsize
                        + weight_bytes
                        + R * lane_out * jnp.dtype(x.dtype).itemsize),
    )

    # Weights/biases are tiny and grid-invariant: constant-index full blocks
    # (the pipeline skips re-fetching blocks whose index does not change).
    full = lambda shape: pl.BlockSpec(shape, lambda i: (0, 0))

    y_packed = pl.pallas_call(
        _mlp_kernel,
        out_shape=jax.ShapeDtypeStruct((R, lane_out), x.dtype),
        grid_spec=pltpu.PrefetchScalarGridSpec(
            num_scalar_prefetch=0,
            grid=grid,
            in_specs=[
                pl.BlockSpec((tr, lane_in), lambda i: (i, 0)),   # packed x rows
                full((lane_in, lane_h1)), full((1, lane_h1)),
                full((lane_h1, lane_h2)), full((1, lane_h2)),
                full((lane_h2, lane_out)), full((1, lane_out)),
            ],
            out_specs=pl.BlockSpec((tr, lane_out), lambda i: (i, 0)),
        ),
        compiler_params=pltpu.CompilerParams(
            dimension_semantics=("parallel",),
            # Explicit limit: above v5e's 16 MiB scoped default, within v7x's
            # 64 MiB physical VMEM (per-step usage at tr=2048 is ~12 MiB).
            vmem_limit_bytes=32 * 1024 * 1024,
        ),
        cost_estimate=cost,
    )(x_packed, w1b, b1b, w2b, b2b, w3b, b3b)

    # Free row-major reshape back to (B_pad, out); drop padded rows if any.
    y = y_packed.reshape(B_pad, out_dim)
    if B_pad != B:
        y = y[:B]
    return y


def init_params(key, input_size, hidden_size1, hidden_size2, output_size):
    """Deterministic init mirroring nn.Linear's U(-1/sqrt(fan_in), 1/sqrt(fan_in)).

    Weights are stored in PyTorch layout: (out_features, in_features); biases (out,)."""
    ks = jax.random.split(key, 6)

    def linear(kw, kb, fan_in, fan_out):
        bound = float(fan_in) ** -0.5
        w = jax.random.uniform(kw, (fan_out, fan_in), jnp.float32, -bound, bound)
        b = jax.random.uniform(kb, (fan_out,), jnp.float32, -bound, bound)
        return w, b

    w1, b1 = linear(ks[0], ks[1], input_size, hidden_size1)
    w2, b2 = linear(ks[2], ks[3], hidden_size1, hidden_size2)
    w3, b3 = linear(ks[4], ks[5], hidden_size2, output_size)
    return {"w1": w1, "b1": b1, "w2": w2, "b2": b2, "w3": w3, "b3": b3}


def _reference(x, p):
    h1 = jnp.maximum(x @ p["w1"].T + p["b1"], 0.0)
    h2 = jnp.maximum(h1 @ p["w2"].T + p["b2"], 0.0)
    return h2 @ p["w3"].T + p["b3"]


if __name__ == "__main__":
    # Small shapes consistent with the module's forward: x = (batch, input_size)
    batch, input_size, hidden1, hidden2, output_size = 8, 16, 32, 32, 4

    key = jax.random.PRNGKey(0)
    k_x, k_p, k_x2, k_x3 = jax.random.split(key, 4)

    x = jax.random.normal(k_x, (batch, input_size), jnp.float32)
    params = init_params(k_p, input_size, hidden1, hidden2, output_size)
    y_ref = _reference(x, params)

    # 1) Full-f32 run: tight correctness check against the JAX reference.
    y_f32 = jax.block_until_ready(
        path_time_predictor(x, params, compute_dtype=jnp.float32))
    assert y_f32.shape == (batch, output_size)
    assert jnp.allclose(y_f32, y_ref, atol=1e-3, rtol=1e-3), "f32 mismatch vs reference"

    # 2) Default bf16-operand run (fast path on v6e/v7x): loose tolerance.
    y_bf16 = jax.block_until_ready(path_time_predictor(x, params))
    assert y_bf16.shape == (batch, output_size)
    assert jnp.allclose(y_bf16, y_ref, atol=5e-2, rtol=5e-2), "bf16 mismatch vs reference"

    # 3) Ragged batch (not a multiple of 8): exercises the pad path, single step.
    x_med = jax.random.normal(k_x2, (300, input_size), jnp.float32)
    y_med = jax.block_until_ready(
        path_time_predictor(x_med, params, compute_dtype=jnp.float32))
    assert y_med.shape == (300, output_size)
    assert jnp.allclose(y_med, _reference(x_med, params), atol=1e-3, rtol=1e-3), \
        "ragged-batch mismatch vs reference"

    # 4) Large ragged batch: >=4-step pipelined grid + partial final block.
    x_big = jax.random.normal(k_x3, (33001, input_size), jnp.float32)
    y_big = jax.block_until_ready(
        path_time_predictor(x_big, params, compute_dtype=jnp.float32))
    assert y_big.shape == (33001, output_size)
    assert jnp.allclose(y_big, _reference(x_big, params), atol=1e-2, rtol=1e-2), \
        "multi-tile mismatch vs reference"

    print("KERNEL_OK")
</pallas_src>

<mosaic_0001>
module attributes {stable_mosaic.version = 11 : i64} {
  func.func @_mlp_kernel(%arg0: i32, %arg1: memref<1x128xf32, #tpu.memory_space<vmem>>, %arg2: memref<128x256xf32, #tpu.memory_space<vmem>>, %arg3: memref<1x256xf32, #tpu.memory_space<vmem>>, %arg4: memref<256x256xf32, #tpu.memory_space<vmem>>, %arg5: memref<1x256xf32, #tpu.memory_space<vmem>>, %arg6: memref<256x32xf32, #tpu.memory_space<vmem>>, %arg7: memref<1x32xf32, #tpu.memory_space<vmem>>, %arg8: memref<1x32xf32, #tpu.memory_space<vmem>>) attributes {dimension_semantics = [#tpu.dimension_semantics<parallel>], iteration_bounds = array<i64: 1>, scalar_prefetch = 0 : i64, scratch_operands = 0 : i64, tpu.core_type = #tpu.core_type<tc>, window_params = [{transform_indices = @transform_0, window_bounds = array<i64: 1, 128>}, {pipeline_mode = #tpu.pipeline_mode<synchronous>, transform_indices = @transform_1, window_bounds = array<i64: 128, 256>}, {pipeline_mode = #tpu.pipeline_mode<synchronous>, transform_indices = @transform_2, window_bounds = array<i64: 1, 256>}, {pipeline_mode = #tpu.pipeline_mode<synchronous>, transform_indices = @transform_3, window_bounds = array<i64: 256, 256>}, {pipeline_mode = #tpu.pipeline_mode<synchronous>, transform_indices = @transform_4, window_bounds = array<i64: 1, 256>}, {pipeline_mode = #tpu.pipeline_mode<synchronous>, transform_indices = @transform_5, window_bounds = array<i64: 256, 32>}, {pipeline_mode = #tpu.pipeline_mode<synchronous>, transform_indices = @transform_6, window_bounds = array<i64: 1, 32>}, {transform_indices = @transform_7, window_bounds = array<i64: 1, 32>}]} {
    %c0 = arith.constant 0 : index
    %c0_0 = arith.constant 0 : index
    %0 = vector.load %arg1[%c0, %c0_0] : memref<1x128xf32, #tpu.memory_space<vmem>>, vector<1x128xf32>
    %c0_1 = arith.constant 0 : index
    %c0_2 = arith.constant 0 : index
    %1 = vector.load %arg2[%c0_1, %c0_2] : memref<128x256xf32, #tpu.memory_space<vmem>>, vector<128x256xf32>
    %cst = arith.constant dense<0.000000e+00> : vector<1x256xf32>
    %2 = tpu.matmul %0, %1, %cst {dimension_numbers = #tpu.dot_dimension_numbers<[1], [0], [0], [1], [0, 0, 1, 1], [], []>} : vector<1x128xf32>, vector<128x256xf32>, vector<1x256xf32> -> vector<1x256xf32>
    %c0_3 = arith.constant 0 : index
    %c0_4 = arith.constant 0 : index
    %3 = vector.load %arg3[%c0_3, %c0_4] : memref<1x256xf32, #tpu.memory_space<vmem>>, vector<1x256xf32>
    %4 = arith.addf %2, %3 : vector<1x256xf32>
    %cst_5 = arith.constant 0.000000e+00 : f32
    %5 = vector.broadcast %cst_5 : f32 to vector<1x256xf32>
    %6 = arith.maximumf %4, %5 : vector<1x256xf32>
    %c0_6 = arith.constant 0 : index
    %c0_7 = arith.constant 0 : index
    %7 = vector.load %arg4[%c0_6, %c0_7] : memref<256x256xf32, #tpu.memory_space<vmem>>, vector<256x256xf32>
    %cst_8 = arith.constant dense<0.000000e+00> : vector<1x256xf32>
    %8 = tpu.matmul %6, %7, %cst_8 {dimension_numbers = #tpu.dot_dimension_numbers<[1], [0], [0], [1], [0, 0, 1, 1], [], []>} : vector<1x256xf32>, vector<256x256xf32>, vector<1x256xf32> -> vector<1x256xf32>
    %c0_9 = arith.constant 0 : index
    %c0_10 = arith.constant 0 : index
    %9 = vector.load %arg5[%c0_9, %c0_10] : memref<1x256xf32, #tpu.memory_space<vmem>>, vector<1x256xf32>
    %10 = arith.addf %8, %9 : vector<1x256xf32>
    %cst_11 = arith.constant 0.000000e+00 : f32
    %11 = vector.broadcast %cst_11 : f32 to vector<1x256xf32>
    %12 = arith.maximumf %10, %11 : vector<1x256xf32>
    %c0_12 = arith.constant 0 : index
    %c0_13 = arith.constant 0 : index
    %13 = vector.load %arg6[%c0_12, %c0_13] : memref<256x32xf32, #tpu.memory_space<vmem>>, vector<256x32xf32>
    %cst_14 = arith.constant dense<0.000000e+00> : vector<1x32xf32>
    %14 = tpu.matmul %12, %13, %cst_14 {dimension_numbers = #tpu.dot_dimension_numbers<[1], [0], [0], [1], [0, 0, 1, 1], [], []>} : vector<1x256xf32>, vector<256x32xf32>, vector<1x32xf32> -> vector<1x32xf32>
    %c0_15 = arith.constant 0 : index
    %c0_16 = arith.constant 0 : index
    %15 = vector.load %arg7[%c0_15, %c0_16] : memref<1x32xf32, #tpu.memory_space<vmem>>, vector<1x32xf32>
    %16 = arith.addf %14, %15 : vector<1x32xf32>
    %c0_17 = arith.constant 0 : index
    %c0_18 = arith.constant 0 : index
    %17 = vector.load %arg8[%c0_17, %c0_18] : memref<1x32xf32, #tpu.memory_space<vmem>>, vector<1x32xf32>
    tpu.vector_store %arg8[%c0_17, %c0_18], %16 {strides = array<i32>} : memref<1x32xf32, #tpu.memory_space<vmem>>, vector<1x32xf32>,
    return
  }
  func.func @transform_0(%arg0: i32) -> (i32, i32) {
    %c0_i32 = arith.constant 0 : i32
    %c0_i32_0 = arith.constant 0 : i32
    return %arg0, %c0_i32 : i32, i32
  }
  func.func @transform_1(%arg0: i32) -> (i32, i32) {
    %c0_i32 = arith.constant 0 : i32
    %c0_i32_0 = arith.constant 0 : i32
    %c0_i32_1 = arith.constant 0 : i32
    return %c0_i32, %c0_i32_0 : i32, i32
  }
  func.func @transform_2(%arg0: i32) -> (i32, i32) {
    %c0_i32 = arith.constant 0 : i32
    %c0_i32_0 = arith.constant 0 : i32
    %c0_i32_1 = arith.constant 0 : i32
    return %c0_i32, %c0_i32_0 : i32, i32
  }
  func.func @transform_3(%arg0: i32) -> (i32, i32) {
    %c0_i32 = arith.constant 0 : i32
    %c0_i32_0 = arith.constant 0 : i32
    %c0_i32_1 = arith.constant 0 : i32
    return %c0_i32, %c0_i32_0 : i32, i32
  }
  func.func @transform_4(%arg0: i32) -> (i32, i32) {
    %c0_i32 = arith.constant 0 : i32
    %c0_i32_0 = arith.constant 0 : i32
    %c0_i32_1 = arith.constant 0 : i32
    return %c0_i32, %c0_i32_0 : i32, i32
  }
  func.func @transform_5(%arg0: i32) -> (i32, i32) {
    %c0_i32 = arith.constant 0 : i32
    %c0_i32_0 = arith.constant 0 : i32
    %c0_i32_1 = arith.constant 0 : i32
    return %c0_i32, %c0_i32_0 : i32, i32
  }
  func.func @transform_6(%arg0: i32) -> (i32, i32) {
    %c0_i32 = arith.constant 0 : i32
    %c0_i32_0 = arith.constant 0 : i32
    %c0_i32_1 = arith.constant 0 : i32
    return %c0_i32, %c0_i32_0 : i32, i32
  }
  func.func @transform_7(%arg0: i32) -> (i32, i32) {
    %c0_i32 = arith.constant 0 : i32
    %c0_i32_0 = arith.constant 0 : i32
    return %arg0, %c0_i32 : i32, i32
  }
}

</mosaic_0001>

<bundles_post_ra>
// kernel: tpu_custom_call.1
= control target key start
LH: loop header
LB: loop body
LE: loop exit
PB: predicated region body
PF: predicated region fallthrough
CT: control target
= control target key end

     0   :  { %12 = vsyncpa [#allocation3], 0  ;;  %s767_s0 = inlined_call_operand.vmem [shape: f32[1,128], index: 0, kind: input, shape index: {}]   ;;  %s768_s1 = inlined_call_operand.vmem [shape: f32[128,256], index: 1, kind: input, shape index: {}]   ;;  %s769_s2 = inlined_call_operand.vmem [shape: f32[1,256], index: 2, kind: input, shape index: {}]   ;;  %s770_s3 = inlined_call_operand.hbm [shape: f32[256,256], index: 3, kind: input, shape index: {}]   ;;  %s771_s4 = inlined_call_operand.vmem [shape: f32[1,256], index: 4, kind: input, shape index: {}]   ;;  %s772_s5 = inlined_call_operand.vmem [shape: f32[256,32], index: 5, kind: input, shape index: {}]   ;;  %s773_s6 = inlined_call_operand.vmem [shape: f32[1,32], index: 6, kind: input, shape index: {}]   ;;  %s774_s7 = inlined_call_operand.hbm [shape: f32[1,32], index: 7, kind: output, shape index: {}]  }
   0x1   :  { %13 = vsyncpa [#allocation4], 0  ;;  %s512_s24 = smov [#allocation2]  }
   0x2   :  { %s25_s25 = sshll.u32 %s512_s24, 4  ;;  %s26_s25 = int_to_ptr.vmem [resolvable:$true] %s25_s25 }
   0x3   :  { %s476_s26 = scalar_lea.vmem %s26_s25, 8192  ;;  %p481_p1 = scmp.lt.s32.totalorder %s26_s25, %s26_s25 }
   0x4   :  { %p477_p0 = scmp.ne.s32.totalorder %s26_s25, %s476_s26  ;;  %p482_p2 = scmp.lt.s32.totalorder %s476_s26, %s476_s26 }
   0x6   :  { %p483_p3 = por %p482_p2, %p481_p1 }
   0x8   :  { %p484_p4 = pnand %p483_p3, %p477_p0 }
   0xa   :  { %487 = shalt.err (!%p484_p4)
}
   0xb   :  { %s513_s27 = smov 256   ;;  %s514_s28 = smov 16  }
   0xc   :  { %31 = dma.hbm_to_vmem [thread:$0]  %s770_s3, 8192, %s26_s25, [#allocation3], %s513_s27, %s513_s27, %s514_s28  }
   0xd   :  { %508 = dma.done.wait [#allocation3], 8192  }
   0xe   :  { %509 = vsyncadd [#allocation3], 4294959104  ;;  %v515_v0 = vmov 0.0   ;;  %v73_v1 = vld [vmem:[%s768_s1 + $0xf8] sm:$0xff]  ;;  %v72_v2 = vld [vmem:[%s768_s1 + $0xf0] sm:$0xff]  ;;  %vm411_vm0 = vcmask 253952  }
   0xf   :  { %150 = vmatprep.mubr.f32.mxu0 %v515_v0  ;;  %v71_v3 = vld [vmem:[%s768_s1 + $0xe8] sm:$0xff]  ;;  %86 = vmatprep.subr.mxu0 %v73_v1  ;;  %v70_v4 = vld [vmem:[%s768_s1 + $0xe0] sm:$0xff]  ;;  %v69_v5 = vld [vmem:[%s768_s1 + $0xd8] sm:$0xff] }
  0x10   :  { %87 = vmatpush1.msra.mxu0 %v72_v2  ;;  %v68_v6 = vld [vmem:[%s768_s1 + $0xd0] sm:$0xff]  ;;  %v67_v7 = vld [vmem:[%s768_s1 + $0xc8] sm:$0xff]  ;;  %v66_v8 = vld [vmem:[%s768_s1 + $0xc0] sm:$0xff] }
  0x11   :  { %88 = vmatprep.subr.mxu0 %v71_v3  ;;  %v65_v9 = vld [vmem:[%s768_s1 + $0xb8] sm:$0xff]  ;;  %v64_v10 = vld [vmem:[%s768_s1 + $0xb0] sm:$0xff]  ;;  %v63_v11 = vld [vmem:[%s768_s1 + $0xa8] sm:$0xff] }
  0x12   :  { %89 = vmatpush1.msra.mxu0 %v70_v4  ;;  %v62_v12 = vld [vmem:[%s768_s1 + $0xa0] sm:$0xff]  ;;  %v61_v13 = vld [vmem:[%s768_s1 + $0x98] sm:$0xff]  ;;  %v60_v14 = vld [vmem:[%s768_s1 + $0x90] sm:$0xff] }
  0x13   :  { %90 = vmatprep.subr.mxu0 %v69_v5  ;;  %v190_v15 = vld [vmem:[#allocation2 + $0xf8] sm:$0xff]  ;;  %v189_v16 = vld [vmem:[#allocation2 + $0xf0] sm:$0xff]  ;;  %v188_v17 = vld [vmem:[#allocation2 + $0xe8] sm:$0xff] }
  0x14   :  { %91 = vmatpush1.msra.mxu0 %v68_v6  ;;  %v59_v18 = vld [vmem:[%s768_s1 + $0x88] sm:$0xff]  ;;  %235 = vmatprep.subr.mxu1 %v190_v15  ;;  %v187_v19 = vld [vmem:[#allocation2 + $0xe0] sm:$0xff]  ;;  %v186_v21 = vld [vmem:[#allocation2 + $0xd8] sm:$0xff] }
  0x15   :  { %92 = vmatprep.subr.mxu0 %v67_v7  ;;  %v58_v20 = vld [vmem:[%s768_s1 + $0x80] sm:$0xff]  ;;  %236 = vmatpush1.msra.mxu1 %v189_v16  ;;  %v57_v22 = vld [vmem:[%s768_s1 + $0x78] sm:$0xff]  ;;  %v185_v23 = vld [vmem:[#allocation2 + $0xd0] sm:$0xff] }
  0x16   :  { %93 = vmatpush1.msra.mxu0 %v66_v8  ;;  %237 = vmatprep.subr.mxu1 %v188_v17  ;;  %v56_v24 = vld [vmem:[%s768_s1 + $0x70] sm:$0xff]  ;;  %v184_v25 = vld [vmem:[#allocation2 + $0xc8] sm:$0xff]  ;;  %v183_v27 = vld [vmem:[#allocation2 + $0xc0] sm:$0xff] }
  0x17   :  { %94 = vmatprep.subr.mxu0 %v65_v9  ;;  %238 = vmatpush1.msra.mxu1 %v187_v19  ;;  %v55_v26 = vld [vmem:[%s768_s1 + $0x68] sm:$0xff]  ;;  %v54_v28 = vld [vmem:[%s768_s1 + $0x60] sm:$0xff]  ;;  %v182_v29 = vld [vmem:[#allocation2 + $0xb8] sm:$0xff] }
  0x18   :  { %95 = vmatpush1.msra.mxu0 %v64_v10  ;;  %239 = vmatprep.subr.mxu1 %v186_v21  ;;  %v53_v30 = vld [vmem:[%s768_s1 + $0x58] sm:$0xff]  ;;  %v181_v31 = vld [vmem:[#allocation2 + $0xb0] sm:$0xff]  ;;  %v180_v33 = vld [vmem:[#allocation2 + $0xa8] sm:$0xff] }
  0x19   :  { %96 = vmatprep.subr.mxu0 %v63_v11  ;;  %240 = vmatpush1.msra.mxu1 %v185_v23  ;;  %v52_v32 = vld [vmem:[%s768_s1 + $0x50] sm:$0xff]  ;;  %v51_v34 = vld [vmem:[%s768_s1 + $0x48] sm:$0xff]  ;;  %v179_v35 = vld [vmem:[#allocation2 + $0xa0] sm:$0xff] }
  0x1a   :  { %97 = vmatpush1.msra.mxu0 %v62_v12  ;;  %241 = vmatprep.subr.mxu1 %v184_v25  ;;  %v50_v36 = vld [vmem:[%s768_s1 + $0x40] sm:$0xff]  ;;  %v178_v37 = vld [vmem:[#allocation2 + $0x98] sm:$0xff]  ;;  %v177_v39 = vld [vmem:[#allocation2 + $0x90] sm:$0xff] }
  0x1b   :  { %98 = vmatprep.subr.mxu0 %v61_v13  ;;  %242 = vmatpush1.msra.mxu1 %v183_v27  ;;  %v49_v38 = vld [vmem:[%s768_s1 + $0x38] sm:$0xff]  ;;  %v48_v40 = vld [vmem:[%s768_s1 + $0x30] sm:$0xff]  ;;  %v176_v41 = vld [vmem:[#allocation2 + $0x88] sm:$0xff] }
  0x1c   :  { %99 = vmatpush1.msra.mxu0 %v60_v14  ;;  %243 = vmatprep.subr.mxu1 %v182_v29  ;;  %v47_v42 = vld [vmem:[%s768_s1 + $0x28] sm:$0xff]  ;;  %v175_v43 = vld [vmem:[#allocation2 + $0x80] sm:$0xff]  ;;  %v174_v45 = vld [vmem:[#allocation2 + $0x78] sm:$0xff] }
  0x1d   :  { %100 = vmatprep.subr.mxu0 %v59_v18  ;;  %244 = vmatpush1.msra.mxu1 %v181_v31  ;;  %v46_v44 = vld [vmem:[%s768_s1 + $0x20] sm:$0xff]  ;;  %v45_v46 = vld [vmem:[%s768_s1 + $0x18] sm:$0xff]  ;;  %v173_v47 = vld [vmem:[#allocation2 + $0x70] sm:$0xff] }
  0x1e   :  { %101 = vmatpush1.msra.mxu0 %v58_v20  ;;  %245 = vmatprep.subr.mxu1 %v180_v33  ;;  %v44_v48 = vld [vmem:[%s768_s1 + $0x10] sm:$0xff]  ;;  %v172_v49 = vld [vmem:[#allocation2 + $0x68] sm:$0xff]  ;;  %v171_v51 = vld [vmem:[#allocation2 + $0x60] sm:$0xff] }
  0x1f   :  { %102 = vmatprep.subr.mxu0 %v57_v22  ;;  %246 = vmatpush1.msra.mxu1 %v179_v35  ;;  %v43_v50 = vld [vmem:[%s768_s1 + $0x8] sm:$0xff]  ;;  %v42_v52 = vld [vmem:[%s768_s1] sm:$0xff]  ;;  %v170_v53 = vld [vmem:[#allocation2 + $0x58] sm:$0xff] }
  0x20   :  { %103 = vmatpush1.msra.mxu0 %v56_v24  ;;  %247 = vmatprep.subr.mxu1 %v178_v37  ;;  %v41_v54 = vld [vmem:[%s767_s0] sm:$0x1]  ;;  %v169_v55 = vld [vmem:[#allocation2 + $0x50] sm:$0xff]  ;;  %v168_v56 = vld [vmem:[#allocation2 + $0x48] sm:$0xff] }
  0x21   :  { %104 = vmatprep.subr.mxu0 %v55_v26  ;;  %248 = vmatpush1.msra.mxu1 %v177_v39  ;;  %v167_v57 = vld [vmem:[#allocation2 + $0x40] sm:$0xff]  ;;  %v166_v58 = vld [vmem:[#allocation2 + $0x38] sm:$0xff]  ;;  %v165_v59 = vld [vmem:[#allocation2 + $0x30] sm:$0xff] }
  0x22   :  { %105 = vmatpush1.msra.mxu0 %v54_v28  ;;  %249 = vmatprep.subr.mxu1 %v176_v41  ;;  %v164_v60 = vld [vmem:[#allocation2 + $0x28] sm:$0xff]  ;;  %v163_v61 = vld [vmem:[#allocation2 + $0x20] sm:$0xff]  ;;  %v162_v62 = vld [vmem:[#allocation2 + $0x18] sm:$0xff] }
  0x23   :  { %106 = vmatprep.subr.mxu0 %v53_v30  ;;  %250 = vmatpush1.msra.mxu1 %v175_v43  ;;  %v161_v63 = vld [vmem:[#allocation2 + $0x10] sm:$0xff]  ;;  %v160_v0 = vld [vmem:[#allocation2 + $0x8] sm:$0xff]  ;;  %v159_v1 = vld [vmem:[#allocation2] sm:$0xff] }
  0x24   :  { %107 = vmatpush1.msra.mxu0 %v52_v32  ;;  %251 = vmatprep.subr.mxu1 %v174_v45  ;;  %v222_v2 = vld [vmem:[#allocation2 + $0x1f8] sm:$0xff]  ;;  %v221_v3 = vld [vmem:[#allocation2 + $0x1f0] sm:$0xff]  ;;  %v220_v4 = vld [vmem:[#allocation2 + $0x1e8] sm:$0xff] }
  0x25   :  { %108 = vmatprep.subr.mxu0 %v51_v34  ;;  %252 = vmatpush1.msra.mxu1 %v173_v47  ;;  %v219_v5 = vld [vmem:[#allocation2 + $0x1e0] sm:$0xff]  ;;  %v218_v6 = vld [vmem:[#allocation2 + $0x1d8] sm:$0xff]  ;;  %v217_v7 = vld [vmem:[#allocation2 + $0x1d0] sm:$0xff] }
  0x26   :  { %109 = vmatpush1.msra.mxu0 %v50_v36  ;;  %253 = vmatprep.subr.mxu1 %v172_v49  ;;  %v216_v8 = vld [vmem:[#allocation2 + $0x1c8] sm:$0xff]  ;;  %v215_v9 = vld [vmem:[#allocation2 + $0x1c0] sm:$0xff]  ;;  %v214_v10 = vld [vmem:[#allocation2 + $0x1b8] sm:$0xff] }
  0x27   :  { %110 = vmatprep.subr.mxu0 %v49_v38  ;;  %254 = vmatpush1.msra.mxu1 %v171_v51  ;;  %v213_v11 = vld [vmem:[#allocation2 + $0x1b0] sm:$0xff]  ;;  %v212_v12 = vld [vmem:[#allocation2 + $0x1a8] sm:$0xff]  ;;  %v211_v13 = vld [vmem:[#allocation2 + $0x1a0] sm:$0xff] }
  0x28   :  { %111 = vmatpush1.msra.mxu0 %v48_v40  ;;  %255 = vmatprep.subr.mxu1 %v170_v53  ;;  %v210_v14 = vld [vmem:[#allocation2 + $0x198] sm:$0xff]  ;;  %v209_v15 = vld [vmem:[#allocation2 + $0x190] sm:$0xff]  ;;  %v208_v16 = vld [vmem:[#allocation2 + $0x188] sm:$0xff] }
  0x29   :  { %112 = vmatprep.subr.mxu0 %v47_v42  ;;  %256 = vmatpush1.msra.mxu1 %v169_v55  ;;  %v207_v17 = vld [vmem:[#allocation2 + $0x180] sm:$0xff]  ;;  %v206_v18 = vld [vmem:[#allocation2 + $0x178] sm:$0xff]  ;;  %v205_v19 = vld [vmem:[#allocation2 + $0x170] sm:$0xff] }
  0x2a   :  { %113 = vmatpush1.msra.mxu0 %v46_v44  ;;  %257 = vmatprep.subr.mxu1 %v168_v56  ;;  %v204_v20 = vld [vmem:[#allocation2 + $0x168] sm:$0xff]  ;;  %v203_v21 = vld [vmem:[#allocation2 + $0x160] sm:$0xff]  ;;  %v202_v22 = vld [vmem:[#allocation2 + $0x158] sm:$0xff] }
  0x2b   :  { %114 = vmatprep.subr.mxu0 %v45_v46  ;;  %258 = vmatpush1.msra.mxu1 %v167_v57  ;;  %v201_v23 = vld [vmem:[#allocation2 + $0x150] sm:$0xff]  ;;  %v200_v24 = vld [vmem:[#allocation2 + $0x148] sm:$0xff]  ;;  %v199_v25 = vld [vmem:[#allocation2 + $0x140] sm:$0xff] }
  0x2c   :  { %115 = vmatpush1.msra.mxu0 %v44_v48  ;;  %259 = vmatprep.subr.mxu1 %v166_v58  ;;  %v198_v26 = vld [vmem:[#allocation2 + $0x138] sm:$0xff]  ;;  %v197_v27 = vld [vmem:[#allocation2 + $0x130] sm:$0xff]  ;;  %v196_v28 = vld [vmem:[#allocation2 + $0x128] sm:$0xff]  ;;  %v76_v58 = vlaneseq }
  0x2d   :  { %116 = vmatprep.subr.mxu0 %v43_v50  ;;  %260 = vmatpush1.msra.mxu1 %v165_v59  ;;  %v195_v29 = vld [vmem:[#allocation2 + $0x120] sm:$0xff]  ;;  %v194_v30 = vld [vmem:[#allocation2 + $0x118] sm:$0xff]  ;;  %v193_v31 = vld [vmem:[#allocation2 + $0x110] sm:$0xff] }
  0x2e   :  { %117 = vmatpush1.msra.mxu0 %v42_v52  ;;  %261 = vmatprep.subr.mxu1 %v164_v60  ;;  %v192_v32 = vld [vmem:[#allocation2 + $0x108] sm:$0xff]  ;;  %v191_v33 = vld [vmem:[#allocation2 + $0x100] sm:$0xff]  ;;  %v339_v34 = vld [vmem:[%s772_s5 + $0xf8] sm:$0xff]  ;;  %v77_v59 = vshrl.u32 %v76_v58, 7 }
  0x2f   :  { %151 = vmatmul.mubr.f32.vlgmr.msra.gmra.mxu0 %v41_v54  ;;  %262 = vmatpush1.msra.mxu1 %v163_v61  ;;  %v323_v35 = vld [vmem:[%s772_s5 + $0x78] sm:$0xff]  ;;  %v338_v36 = vld [vmem:[%s772_s5 + $0xf0] sm:$0xff]  ;;  %v337_v38 = vld [vmem:[%s772_s5 + $0xe8] sm:$0xff] }
  0x30   :  { %263 = vmatprep.subr.mxu1 %v162_v62  ;;  %428 = vmatprep.subr.mxu0 %v339_v34  ;;  %v322_v37 = vld [vmem:[%s772_s5 + $0x70] sm:$0xff]  ;;  %v321_v39 = vld [vmem:[%s772_s5 + $0x68] sm:$0xff]  ;;  %v336_v40 = vld [vmem:[%s772_s5 + $0xe0] sm:$0xff]  ;;  %v78_v60 = vsub.s32 0, %v77_v59  ;;  %v82_v62 = vsub.s32 1, %v77_v59 }
  0x31   :  { %264 = vmatpush1.msra.mxu1 %v161_v63  ;;  %429 = vmatpush3.msra.mxu0 %v323_v35  ;;  %v320_v41 = vld [vmem:[%s772_s5 + $0x60] sm:$0xff]  ;;  %v335_v42 = vld [vmem:[%s772_s5 + $0xd8] sm:$0xff]  ;;  %v334_v44 = vld [vmem:[%s772_s5 + $0xd0] sm:$0xff] }
  0x32   :  { %265 = vmatprep.subr.mxu1 %v160_v0  ;;  %430 = vmatprep.subr.mxu0 %v338_v36  ;;  %v319_v43 = vld [vmem:[%s772_s5 + $0x58] sm:$0xff]  ;;  %v318_v45 = vld [vmem:[%s772_s5 + $0x50] sm:$0xff]  ;;  %v333_v46 = vld [vmem:[%s772_s5 + $0xc8] sm:$0xff] }
  0x33   :  { %266 = vmatpush1.msra.mxu1 %v159_v1  ;;  %431 = vmatpush3.msra.mxu0 %v322_v37  ;;  %v317_v47 = vld [vmem:[%s772_s5 + $0x48] sm:$0xff]  ;;  %v332_v48 = vld [vmem:[%s772_s5 + $0xc0] sm:$0xff]  ;;  %v331_v50 = vld [vmem:[%s772_s5 + $0xb8] sm:$0xff] }
  0x34   :  { %267 = vmatprep.subr.mxu1 %v222_v2  ;;  %432 = vmatprep.subr.mxu0 %v337_v38  ;;  %v316_v49 = vld [vmem:[%s772_s5 + $0x40] sm:$0xff]  ;;  %v315_v51 = vld [vmem:[%s772_s5 + $0x38] sm:$0xff]  ;;  %v330_v52 = vld [vmem:[%s772_s5 + $0xb0] sm:$0xff] }
  0x35   :  { %268 = vmatpush2.msra.mxu1 %v221_v3  ;;  %433 = vmatpush3.msra.mxu0 %v321_v39  ;;  %v314_v53 = vld [vmem:[%s772_s5 + $0x30] sm:$0xff]  ;;  %v329_v54 = vld [vmem:[%s772_s5 + $0xa8] sm:$0xff]  ;;  %v328_v56 = vld [vmem:[%s772_s5 + $0xa0] sm:$0xff] }
  0x36   :  { %269 = vmatprep.subr.mxu1 %v220_v4  ;;  %434 = vmatprep.subr.mxu0 %v336_v40  ;;  %v313_v55 = vld [vmem:[%s772_s5 + $0x28] sm:$0xff]  ;;  %v312_v57 = vld [vmem:[%s772_s5 + $0x20] sm:$0xff] }
  0x37   :  { %270 = vmatpush2.msra.mxu1 %v219_v5  ;;  %435 = vmatpush3.msra.mxu0 %v320_v41  ;;  %v74_v61 = vld [vmem:[%s769_s2] sm:$0x3] }
  0x38   :  { %271 = vmatprep.subr.mxu1 %v218_v6  ;;  %436 = vmatprep.subr.mxu0 %v335_v42  ;;  %v79_v63 = vrot.slane %v74_v61, %v78_v60  ;;  %v83_v0 = vrot.slane %v74_v61, %v82_v62 }
  0x39   :  { %272 = vmatpush2.msra.mxu1 %v217_v7  ;;  %437 = vmatpush3.msra.mxu0 %v319_v43  ;;  %v327_v7 = vld [vmem:[%s772_s5 + $0x98] sm:$0xff] }
  0x3a   :  { %273 = vmatprep.subr.mxu1 %v216_v8  ;;  %438 = vmatprep.subr.mxu0 %v334_v44  ;;  %v311_v8 = vld [vmem:[%s772_s5 + $0x18] sm:$0xff] }
  0x3b   :  { %274 = vmatpush2.msra.mxu1 %v215_v9  ;;  %439 = vmatpush3.msra.mxu0 %v318_v45  ;;  %v326_v9 = vld [vmem:[%s772_s5 + $0x90] sm:$0xff] }
  0x3c   :  { %275 = vmatprep.subr.mxu1 %v214_v10  ;;  %440 = vmatprep.subr.mxu0 %v333_v46  ;;  %v310_v10 = vld [vmem:[%s772_s5 + $0x10] sm:$0xff] }
  0x3d   :  { %276 = vmatpush2.msra.mxu1 %v213_v11  ;;  %441 = vmatpush3.msra.mxu0 %v317_v47  ;;  %v325_v11 = vld [vmem:[%s772_s5 + $0x88] sm:$0xff] }
  0x3e   :  { %277 = vmatprep.subr.mxu1 %v212_v12  ;;  %442 = vmatprep.subr.mxu0 %v332_v48  ;;  %v309_v12 = vld [vmem:[%s772_s5 + $0x8] sm:$0xff] }
  0x3f   :  { %278 = vmatpush2.msra.mxu1 %v211_v13  ;;  %443 = vmatpush3.msra.mxu0 %v316_v49  ;;  %v324_v13 = vld [vmem:[%s772_s5 + $0x80] sm:$0xff] }
  0x40   :  { %279 = vmatprep.subr.mxu1 %v210_v14  ;;  %444 = vmatprep.subr.mxu0 %v331_v50  ;;  %v308_v14 = vld [vmem:[%s772_s5] sm:$0xff]  ;;  %s516_s5 = smov [#allocation5]  }
  0x41   :  { %280 = vmatpush2.msra.mxu1 %v209_v15  ;;  %445 = vmatpush3.msra.mxu0 %v315_v51  ;;  %v223_v15 = vld [vmem:[%s771_s4] sm:$0x3]  ;;  %s419_s16 = sshll.u32 %s516_s5, 4  ;;  %s420_s16 = int_to_ptr.vmem [resolvable:$true] %s419_s16 }
  0x42   :  { %281 = vmatprep.subr.mxu1 %v208_v16  ;;  %446 = vmatprep.subr.mxu0 %v330_v52  ;;  %v228_v16 = vrot.slane %v223_v15, %v78_v60  ;;  %s488_s4 = scalar_lea.vmem %s420_s16, 16  ;;  %s492_s17 = scalar_lea.vmem %s420_s16, 32 }
  0x43   :  { %282 = vmatpush2.msra.mxu1 %v207_v17  ;;  %447 = vmatpush3.msra.mxu0 %v314_v53  ;;  %v232_v17 = vrot.slane %v223_v15, %v82_v62  ;;  %p489_p5 = scmp.ne.s32.totalorder %s420_s16, %s488_s4  ;;  %p493_p6 = scmp.lt.s32.totalorder %s420_s16, %s420_s16 }
  0x44   :  { %283 = vmatprep.subr.mxu1 %v206_v18  ;;  %448 = vmatprep.subr.mxu0 %v329_v54  ;;  %p494_p7 = scmp.lt.s32.totalorder %s492_s17, %s488_s4 }
  0x45   :  { %284 = vmatpush2.msra.mxu1 %v205_v19  ;;  %449 = vmatpush3.msra.mxu0 %v313_v55 }
  0x46   :  { %285 = vmatprep.subr.mxu1 %v204_v20  ;;  %450 = vmatprep.subr.mxu0 %v328_v56  ;;  %p495_p8 = por %p494_p7, %p493_p6 }
  0x47   :  { %286 = vmatpush2.msra.mxu1 %v203_v21  ;;  %451 = vmatpush3.msra.mxu0 %v312_v57 }
  0x48   :  { %287 = vmatprep.subr.mxu1 %v202_v22  ;;  %452 = vmatprep.subr.mxu0 %v327_v7  ;;  %p496_p9 = pnand %p495_p8, %p489_p5 }
  0x49   :  { %288 = vmatpush2.msra.mxu1 %v201_v23  ;;  %453 = vmatpush3.msra.mxu0 %v311_v8 }
  0x4a   :  { %289 = vmatprep.subr.mxu1 %v200_v24  ;;  %454 = vmatprep.subr.mxu0 %v326_v9 }
  0x4b   :  { %290 = vmatpush2.msra.mxu1 %v199_v25  ;;  %455 = vmatpush3.msra.mxu0 %v310_v10  ;;  %v340_v25 = vld [vmem:[%s773_s6] sm:$0x1] }
  0x4c   :  { %291 = vmatprep.subr.mxu1 %v198_v26  ;;  %456 = vmatprep.subr.mxu0 %v325_v11 }
  0x4d   :  { %292 = vmatpush2.msra.mxu1 %v197_v27  ;;  %457 = vmatpush3.msra.mxu0 %v309_v12 }
  0x4e   :  { %293 = vmatprep.subr.mxu1 %v196_v28  ;;  %458 = vmatprep.subr.mxu0 %v324_v13 }
  0x4f   :  { %294 = vmatpush2.msra.mxu1 %v195_v29  ;;  %459 = vmatpush3.msra.mxu0 %v308_v14 }
  0x50   :  { %295 = vmatprep.subr.mxu1 %v194_v30 }
  0x51   :  { %296 = vmatpush2.msra.mxu1 %v193_v31 }
  0x52   :  { %297 = vmatprep.subr.mxu1 %v192_v32 }
  0x53   :  { %298 = vmatpush2.msra.mxu1 %v191_v33 }
  0xef   :  { %v152_v1 = vpop.f32.mrf.mxu0 }
  0xf0   :  { %v153_v2 = vadd.f32 %v152_v1, %v79_v63 }
  0xf1   :  { %v154_v3 = vpop.f32.mrf.mxu0 }
  0xf2   :  { %v155_v4 = vadd.f32 %v154_v3, %v83_v0  ;;  %v157_v6 = vmax.f32 %v153_v2, 0.0 }
  0xf4   :  { %v158_v5 = vmax.f32 %v155_v4, 0.0 }
  0xf6   :  { %299 = vmatprep.mubr.f32.mxu1 %v158_v5 }
  0xf7   :  { %300 = vmatmul.mubr.f32.vlgmr.msra.gmra.mxu1 %v157_v6 }
 0x1b7   :  { %v301_v18 = vpop.f32.mrf.mxu1 }
 0x1b8   :  { %v302_v19 = vadd.f32 %v301_v18, %v228_v16 }
 0x1b9   :  { %v303_v20 = vpop.f32.mrf.mxu1 }
 0x1ba   :  { %v304_v21 = vadd.f32 %v303_v20, %v232_v17  ;;  %v306_v23 = vmax.f32 %v302_v19, 0.0 }
 0x1bc   :  { %v307_v22 = vmax.f32 %v304_v21, 0.0 }
 0x1be   :  { %405 = vmatprep.mubr.f32.mxu0 %v307_v22 }
 0x1bf   :  { %406 = vmatmul.mubr.f32.vlgmr.msra.gmra.mxu0 %v306_v23 }
 0x27f   :  { %v460_v24 = vpop.f32.mrf.mxu0 }
 0x281   :  { %v461_v26 = vpop.f32.mrf.mxu0 }
 0x282   :  { %v462_v27 = vadd.f32 %v461_v26, %v460_v24 }
 0x284   :  { %v408_v28 = vadd.f32 %v462_v27, %v340_v25 }
 0x286   :  { %412 = vst.msk [vmem:[#allocation5] sm:$0x1] %vm411_vm0, %v408_v28 }
 0x287   :  { %499 = shalt.err (!%p496_p9)
}
 0x288   :  { %422 = dma.vmem_to_hbm [thread:$0]  %s420_s16, 16, %s774_s7, [#allocation4]  }
 0x289   :  { %510 = dma.done.wait [#allocation4], 16  }
 0x28a   :  { %511 = vsyncadd [#allocation4], 4294967280 }
 0x28b   :  { %426 = vsyncpa [#allocation3], 1 }
 0x28c   :  { %427 = vsyncpa [#allocation4], 1 }

</bundles_post_ra>
